<compile_context>
chip_gen: v7x
topology: tpu7x:2x2x1
jax: 0.10.0
libtpu: 0.0.40
codegen_flags: <defaults>
</compile_context>

<pallas_src>
import functools

import jax
import jax.numpy as jnp
from jax.experimental import pallas as pl
from jax.experimental.pallas import tpu as pltpu

_LANE = 128      # lane width / MXU-friendly output padding
_SUBLANE = 8     # f32 sublane


def _round_up(n, m):
    return ((n + m - 1) // m) * m


def _get_activation_fn(name):
    """Map the module's activation string (the eval'd torch fn) to a jnp fn."""
    if name is None or name == "None":
        return None
    table = {
        "relu": lambda v: jnp.maximum(v, 0.0),
        "torch.relu": lambda v: jnp.maximum(v, 0.0),
        "F.relu": lambda v: jnp.maximum(v, 0.0),
        "tanh": jnp.tanh,
        "torch.tanh": jnp.tanh,
        "sigmoid": jax.nn.sigmoid,
        "torch.sigmoid": jax.nn.sigmoid,
        # torch.nn.functional.gelu defaults to the exact erf form.
        "gelu": functools.partial(jax.nn.gelu, approximate=False),
        "F.gelu": functools.partial(jax.nn.gelu, approximate=False),
    }
    if name not in table:
        raise ValueError(f"unsupported activation: {name!r}")
    return table[name]


def _batch_tile(batch, max_tb=512):
    """Pick the batch tile.

    Big tiles amortize the ~0.35 us per-grid-step pipeline overhead (this
    kernel is overhead/DMA bound, not compute bound); for large batches we cap
    the tile so there are at least 2 grid steps, letting the "parallel" axis
    shard across v7x's 2 TensorCores.
    """
    tb = min(max_tb, _round_up(batch, _SUBLANE))
    if batch >= 256 and pl.cdiv(batch, tb) < 2:
        tb = _round_up(pl.cdiv(batch, 2), _SUBLANE)
    return max(tb, _SUBLANE)


# ----------------------------------------------------------------------------
# Fused Pallas kernel: whole MLP (+ optional fused softmax) in one pass.
# ----------------------------------------------------------------------------
def _fused_mlp_kernel(*refs, num_layers, act_fn, fuse_softmax, valid_out_dim,
                      compute_dtype):
    # refs = (x_ref, w0_ref, b0_ref, w1_ref, b1_ref, ..., o_ref)
    x_ref = refs[0]
    o_ref = refs[-1]

    h = x_ref[...].astype(jnp.float32)
    for li in range(num_layers):
        w_ref = refs[1 + 2 * li]
        b_ref = refs[2 + 2 * li]
        # Weights were pre-cast to compute_dtype (bf16) on the host; only the
        # lhs needs a cast here. Accumulation is f32 on the MXU.
        lhs = h if compute_dtype is None else h.astype(compute_dtype)
        h = jnp.dot(lhs, w_ref[...], preferred_element_type=jnp.float32)
        h = h + b_ref[...].astype(jnp.float32)      # bias / elementwise in f32
        if li < num_layers - 1 and act_fn is not None:
            h = act_fn(h)

    if fuse_softmax:
        lane = jax.lax.broadcasted_iota(jnp.int32, h.shape, dimension=1)
        if valid_out_dim == 2:
            # Binary case: softmax over 2 classes == sigmoid of the logit diff.
            p1 = jax.nn.sigmoid(h[:, 1:2] - h[:, 0:1])
            h = jnp.where(lane == 1, p1, jnp.where(lane == 0, 1.0 - p1, 0.0))
        else:
            # Masked softmax over the valid class lanes only; divide via the
            # EUP reciprocal so it co-issues with the rest of the epilogue.
            valid = lane < valid_out_dim
            logits = jnp.where(valid, h, -jnp.inf)
            m = jnp.max(logits, axis=-1, keepdims=True)
            e = jnp.where(valid, jnp.exp(logits - m), 0.0)
            s = jnp.sum(e, axis=-1, keepdims=True)
            h = e * pl.reciprocal(s, approx=True)

    o_ref[...] = h.astype(o_ref.dtype)              # single lane-dense store


def fused_mlp_pallas(x, params, *, activation=None, fuse_softmax=False,
                     compute_dtype=jnp.bfloat16, out_dtype=None,
                     max_batch_tile=512, param_buffer_count=None):
    """Full tab_mlp forward (optionally + softmax) in one pallas_call.

    params: list of (w, b) with w: [in, out] and b: [out].
    Returns logits [B, out_dim], or probabilities [B, out_dim] if fuse_softmax.
    """
    act_fn = _get_activation_fn(activation)
    num_layers = len(params)
    batch, in_dim = x.shape
    out_dim = params[-1][0].shape[1]
    out_dtype = jnp.float32 if out_dtype is None else out_dtype
    w_dtype = jnp.float32 if compute_dtype is None else compute_dtype

    # Only the *output* dims are padded to 128 lanes (lane-dense stores, clean
    # MXU tiles). x and the first weight's contraction dim stay at in_dim.
    out_ps = [_round_up(w.shape[1], _LANE) for (w, _) in params]
    final_p = out_ps[-1]

    tb = _batch_tile(batch, max_batch_tile)
    grid = (pl.cdiv(batch, tb),)      # ragged last block handled by Pallas

    # Zero-pad the weights (exact: padded cols are zero and the next layer's
    # padded rows are zero, so padded lanes are annihilated even through
    # sigmoid/tanh activations).
    padded = []
    k_prev = in_dim
    for (w, b), n_p in zip(params, out_ps):
        k, n = w.shape
        w_p = jnp.zeros((k_prev, n_p), w_dtype).at[:k, :n].set(w.astype(w_dtype))
        b_p = jnp.zeros((1, n_p), jnp.float32).at[0, :n].set(
            b.astype(jnp.float32))
        padded.append((w_p, b_p))
        k_prev = n_p

    kernel = functools.partial(
        _fused_mlp_kernel, num_layers=num_layers, act_fn=act_fn,
        fuse_softmax=fuse_softmax, valid_out_dim=out_dim,
        compute_dtype=compute_dtype)

    # Weights/biases have a constant index_map (stay VMEM-resident across the
    # batch grid). For large hidden_dim, pass param_buffer_count=1 to single-
    # buffer them and halve their resident VMEM (matters on v7x's 64 MiB).
    param_mode = {}
    if param_buffer_count is not None:
        param_mode = dict(pipeline_mode=pl.Buffered(param_buffer_count))

    in_specs = [pl.BlockSpec((tb, in_dim), lambda i: (i, 0))]
    flat_args = [x]
    for (w_p, b_p) in padded:
        in_specs.append(pl.BlockSpec(w_p.shape, lambda i: (0, 0), **param_mode))
        in_specs.append(pl.BlockSpec(b_p.shape, lambda i: (0, 0), **param_mode))
        flat_args.extend([w_p, b_p])

    # VMEM budget derived against v7x's 64 MiB physical (leave headroom):
    # double-buffered x/out tiles + resident params + live f32 activations.
    param_buf = 2 if param_buffer_count is None else param_buffer_count
    param_bytes = sum(w.size * w.dtype.itemsize + b.size * 4
                      for (w, b) in padded)
    tile_bytes = 4 * tb * (in_dim + final_p)            # x + out tiles (f32)
    act_bytes = 4 * tb * max(out_ps)                    # widest live activation
    vmem_bytes = (2 * tile_bytes + param_buf * param_bytes + 2 * act_bytes
                  + (2 << 20))
    vmem_bytes = int(min(40 << 20, max(16 << 20, vmem_bytes)))

    out = pl.pallas_call(
        kernel,
        out_shape=jax.ShapeDtypeStruct((batch, final_p), out_dtype),
        grid=grid,
        in_specs=in_specs,
        out_specs=pl.BlockSpec((tb, final_p), lambda i: (i, 0)),
        compiler_params=pltpu.CompilerParams(
            dimension_semantics=("parallel",),
            vmem_limit_bytes=vmem_bytes),
    )(*flat_args)

    return out[:, :out_dim]


# ----------------------------------------------------------------------------
# tab_mlp equivalent
# ----------------------------------------------------------------------------
def init_tab_mlp_params(key, input_dim, output_dim, layer_num, hidden_dim):
    """nn.Linear-style init (uniform +-1/sqrt(fan_in)); weights stored [in, out]."""
    if layer_num == 1:
        dims = [(input_dim, output_dim)]
    else:
        dims = []
        for li in range(layer_num):
            if li == 0:
                dims.append((input_dim, hidden_dim))
            elif li == layer_num - 1:
                dims.append((hidden_dim, output_dim))
            else:
                dims.append((hidden_dim, hidden_dim))
    params = []
    for (din, dout) in dims:
        key, kw, kb = jax.random.split(key, 3)
        bound = 1.0 / (float(din) ** 0.5)
        w = jax.random.uniform(kw, (din, dout), jnp.float32, -bound, bound)
        b = jax.random.uniform(kb, (dout,), jnp.float32, -bound, bound)
        params.append((w, b))
    return params


@functools.partial(jax.jit, static_argnames=("activation",))
def tab_mlp_forward(params, x, activation="torch.relu"):
    """tab_mlp.forward: hidden layers get the activation, last layer does not."""
    return fused_mlp_pallas(x, params, activation=activation,
                            fuse_softmax=False)


@functools.partial(jax.jit, static_argnames=("activation",))
def tab_mlp_predict_proba(params, x, activation="torch.relu"):
    """tab_mlp.predict_proba: softmax(forward(x), dim=1)[:, 1], fused in-kernel."""
    probs = fused_mlp_pallas(x, params, activation=activation,
                             fuse_softmax=True)
    return probs[:, 1]


if __name__ == "__main__":
    # Small, module-consistent shapes: tabular input, 2 classes, 3 layers
    # (exercises input->hidden, hidden->hidden, hidden->output paths).
    batch = 8
    input_dim = 32
    hidden_dim = 64
    output_dim = 2        # == class_num
    layer_num = 3
    activation = "torch.relu"   # the module's eval("torch.relu")

    key = jax.random.PRNGKey(0)
    key, kx = jax.random.split(key)
    x = jax.random.normal(kx, (batch, input_dim), jnp.float32)

    params = init_tab_mlp_params(key, input_dim, output_dim, layer_num,
                                 hidden_dim)

    y = tab_mlp_forward(params, x, activation=activation)
    p1 = tab_mlp_predict_proba(params, x, activation=activation)
    jax.block_until_ready(y)
    jax.block_until_ready(p1)

    # References: (a) bf16-matmul / f32-accum (matches the kernel's MXU dtype),
    # (b) pure f32 (module-exact math, looser tolerance for bf16 rounding).
    def ref_forward(compute_dtype):
        h = x
        for li, (w, b) in enumerate(params):
            lhs, rhs = h, w
            if compute_dtype is not None:
                lhs = lhs.astype(compute_dtype)
                rhs = rhs.astype(compute_dtype)
            h = jnp.dot(lhs, rhs, preferred_element_type=jnp.float32) + b
            if li < layer_num - 1:
                h = jnp.maximum(h, 0.0)
        return h

    ref_bf16 = ref_forward(jnp.bfloat16)
    ref_f32 = ref_forward(None)
    ref_p1_bf16 = jax.nn.softmax(ref_bf16, axis=1)[:, 1]
    ref_p1_f32 = jax.nn.softmax(ref_f32, axis=1)[:, 1]

    assert y.shape == (batch, output_dim)
    assert p1.shape == (batch,)
    assert jnp.allclose(y, ref_bf16, atol=2e-3, rtol=2e-3)
    assert jnp.allclose(y, ref_f32, atol=5e-2, rtol=5e-2)
    assert jnp.allclose(p1, ref_p1_bf16, atol=2e-3, rtol=2e-3)
    assert jnp.allclose(p1, ref_p1_f32, atol=5e-2, rtol=5e-2)

    print("KERNEL_OK")
</pallas_src>

<mosaic_0001>
module attributes {stable_mosaic.version = 11 : i64} {
  func.func @_fused_mlp_kernel(%arg0: i32, %arg1: memref<8x32xf32, #tpu.memory_space<vmem>>, %arg2: memref<32x128xbf16, #tpu.memory_space<vmem>>, %arg3: memref<1x128xf32, #tpu.memory_space<vmem>>, %arg4: memref<128x128xbf16, #tpu.memory_space<vmem>>, %arg5: memref<1x128xf32, #tpu.memory_space<vmem>>, %arg6: memref<128x128xbf16, #tpu.memory_space<vmem>>, %arg7: memref<1x128xf32, #tpu.memory_space<vmem>>, %arg8: memref<8x128xf32, #tpu.memory_space<vmem>>) attributes {dimension_semantics = [#tpu.dimension_semantics<parallel>], iteration_bounds = array<i64: 1>, scalar_prefetch = 0 : i64, scratch_operands = 0 : i64, tpu.core_type = #tpu.core_type<tc>, window_params = [{transform_indices = @transform_0, window_bounds = array<i64: 8, 32>}, {pipeline_mode = #tpu.pipeline_mode<synchronous>, transform_indices = @transform_1, window_bounds = array<i64: 32, 128>}, {pipeline_mode = #tpu.pipeline_mode<synchronous>, transform_indices = @transform_2, window_bounds = array<i64: 1, 128>}, {pipeline_mode = #tpu.pipeline_mode<synchronous>, transform_indices = @transform_3, window_bounds = array<i64: 128, 128>}, {pipeline_mode = #tpu.pipeline_mode<synchronous>, transform_indices = @transform_4, window_bounds = array<i64: 1, 128>}, {pipeline_mode = #tpu.pipeline_mode<synchronous>, transform_indices = @transform_5, window_bounds = array<i64: 128, 128>}, {pipeline_mode = #tpu.pipeline_mode<synchronous>, transform_indices = @transform_6, window_bounds = array<i64: 1, 128>}, {transform_indices = @transform_7, window_bounds = array<i64: 8, 128>}]} {
    %c0 = arith.constant 0 : index
    %c0_0 = arith.constant 0 : index
    %0 = vector.load %arg1[%c0, %c0_0] : memref<8x32xf32, #tpu.memory_space<vmem>>, vector<8x32xf32>
    %1 = arith.truncf %0 : vector<8x32xf32> to vector<8x32xbf16>
    %c0_1 = arith.constant 0 : index
    %c0_2 = arith.constant 0 : index
    %2 = vector.load %arg2[%c0_1, %c0_2] : memref<32x128xbf16, #tpu.memory_space<vmem>>, vector<32x128xbf16>
    %cst = arith.constant dense<0.000000e+00> : vector<8x128xf32>
    %3 = tpu.matmul %1, %2, %cst {dimension_numbers = #tpu.dot_dimension_numbers<[1], [0], [0], [1], [0, 0, 1, 1], [], []>} : vector<8x32xbf16>, vector<32x128xbf16>, vector<8x128xf32> -> vector<8x128xf32>
    %c0_3 = arith.constant 0 : index
    %c0_4 = arith.constant 0 : index
    %4 = vector.load %arg3[%c0_3, %c0_4] : memref<1x128xf32, #tpu.memory_space<vmem>>, vector<1x128xf32>
    %5 = vector.broadcast %4 : vector<1x128xf32> to vector<8x128xf32>
    %6 = arith.addf %3, %5 : vector<8x128xf32>
    %cst_5 = arith.constant 0.000000e+00 : f32
    %7 = vector.broadcast %cst_5 : f32 to vector<8x128xf32>
    %8 = arith.maximumf %6, %7 : vector<8x128xf32>
    %9 = arith.truncf %8 : vector<8x128xf32> to vector<8x128xbf16>
    %c0_6 = arith.constant 0 : index
    %c0_7 = arith.constant 0 : index
    %10 = vector.load %arg4[%c0_6, %c0_7] : memref<128x128xbf16, #tpu.memory_space<vmem>>, vector<128x128xbf16>
    %cst_8 = arith.constant dense<0.000000e+00> : vector<8x128xf32>
    %11 = tpu.matmul %9, %10, %cst_8 {dimension_numbers = #tpu.dot_dimension_numbers<[1], [0], [0], [1], [0, 0, 1, 1], [], []>} : vector<8x128xbf16>, vector<128x128xbf16>, vector<8x128xf32> -> vector<8x128xf32>
    %c0_9 = arith.constant 0 : index
    %c0_10 = arith.constant 0 : index
    %12 = vector.load %arg5[%c0_9, %c0_10] : memref<1x128xf32, #tpu.memory_space<vmem>>, vector<1x128xf32>
    %13 = vector.broadcast %12 : vector<1x128xf32> to vector<8x128xf32>
    %14 = arith.addf %11, %13 : vector<8x128xf32>
    %cst_11 = arith.constant 0.000000e+00 : f32
    %15 = vector.broadcast %cst_11 : f32 to vector<8x128xf32>
    %16 = arith.maximumf %14, %15 : vector<8x128xf32>
    %17 = arith.truncf %16 : vector<8x128xf32> to vector<8x128xbf16>
    %c0_12 = arith.constant 0 : index
    %c0_13 = arith.constant 0 : index
    %18 = vector.load %arg6[%c0_12, %c0_13] : memref<128x128xbf16, #tpu.memory_space<vmem>>, vector<128x128xbf16>
    %cst_14 = arith.constant dense<0.000000e+00> : vector<8x128xf32>
    %19 = tpu.matmul %17, %18, %cst_14 {dimension_numbers = #tpu.dot_dimension_numbers<[1], [0], [0], [1], [0, 0, 1, 1], [], []>} : vector<8x128xbf16>, vector<128x128xbf16>, vector<8x128xf32> -> vector<8x128xf32>
    %c0_15 = arith.constant 0 : index
    %c0_16 = arith.constant 0 : index
    %20 = vector.load %arg7[%c0_15, %c0_16] : memref<1x128xf32, #tpu.memory_space<vmem>>, vector<1x128xf32>
    %21 = vector.broadcast %20 : vector<1x128xf32> to vector<8x128xf32>
    %22 = arith.addf %19, %21 : vector<8x128xf32>
    %c0_17 = arith.constant 0 : index
    %c0_18 = arith.constant 0 : index
    %23 = vector.load %arg8[%c0_17, %c0_18] : memref<8x128xf32, #tpu.memory_space<vmem>>, vector<8x128xf32>
    tpu.vector_store %arg8[%c0_17, %c0_18], %22 {strides = array<i32>} : memref<8x128xf32, #tpu.memory_space<vmem>>, vector<8x128xf32>,
    return
  }
  func.func @transform_0(%arg0: i32) -> (i32, i32) {
    %c0_i32 = arith.constant 0 : i32
    %c0_i32_0 = arith.constant 0 : i32
    return %arg0, %c0_i32 : i32, i32
  }
  func.func @transform_1(%arg0: i32) -> (i32, i32) {
    %c0_i32 = arith.constant 0 : i32
    %c0_i32_0 = arith.constant 0 : i32
    %c0_i32_1 = arith.constant 0 : i32
    return %c0_i32, %c0_i32_0 : i32, i32
  }
  func.func @transform_2(%arg0: i32) -> (i32, i32) {
    %c0_i32 = arith.constant 0 : i32
    %c0_i32_0 = arith.constant 0 : i32
    %c0_i32_1 = arith.constant 0 : i32
    return %c0_i32, %c0_i32_0 : i32, i32
  }
  func.func @transform_3(%arg0: i32) -> (i32, i32) {
    %c0_i32 = arith.constant 0 : i32
    %c0_i32_0 = arith.constant 0 : i32
    %c0_i32_1 = arith.constant 0 : i32
    return %c0_i32, %c0_i32_0 : i32, i32
  }
  func.func @transform_4(%arg0: i32) -> (i32, i32) {
    %c0_i32 = arith.constant 0 : i32
    %c0_i32_0 = arith.constant 0 : i32
    %c0_i32_1 = arith.constant 0 : i32
    return %c0_i32, %c0_i32_0 : i32, i32
  }
  func.func @transform_5(%arg0: i32) -> (i32, i32) {
    %c0_i32 = arith.constant 0 : i32
    %c0_i32_0 = arith.constant 0 : i32
    %c0_i32_1 = arith.constant 0 : i32
    return %c0_i32, %c0_i32_0 : i32, i32
  }
  func.func @transform_6(%arg0: i32) -> (i32, i32) {
    %c0_i32 = arith.constant 0 : i32
    %c0_i32_0 = arith.constant 0 : i32
    %c0_i32_1 = arith.constant 0 : i32
    return %c0_i32, %c0_i32_0 : i32, i32
  }
  func.func @transform_7(%arg0: i32) -> (i32, i32) {
    %c0_i32 = arith.constant 0 : i32
    %c0_i32_0 = arith.constant 0 : i32
    return %arg0, %c0_i32 : i32, i32
  }
}

</mosaic_0001>

<bundles_post_ra>
// kernel: tab_mlp_forward.1
= control target key start
LH: loop header
LB: loop body
LE: loop exit
PB: predicated region body
PF: predicated region fallthrough
CT: control target
= control target key end

     0   :  { %v438_v0 = vmov 0.0   ;;  %vm439_vm0 = vmmov 0   ;;  %vm52_vm1 = vcmask 261120   ;;  %s573_s1 = inlined_call_operand.vmem [shape: bf16[32,128], index: 1, kind: input, shape index: {}]   ;;  %s574_s0 = inlined_call_operand.vmem [shape: f32[8,32], index: 0, kind: input, shape index: {}]   ;;  %s575_s3 = inlined_call_operand.vmem [shape: bf16[128,128], index: 3, kind: input, shape index: {}]   ;;  %s576_s5 = inlined_call_operand.vmem [shape: bf16[128,128], index: 5, kind: input, shape index: {}]   ;;  %s577_s2 = inlined_call_operand.vmem [shape: f32[1,128], index: 2, kind: input, shape index: {}]   ;;  %s578_s4 = inlined_call_operand.vmem [shape: f32[1,128], index: 4, kind: input, shape index: {}]   ;;  %s579_s6 = inlined_call_operand.vmem [shape: f32[1,128], index: 6, kind: input, shape index: {}]   ;;  %s580_s7 = inlined_call_operand.vmem [shape: f32[8,128], index: 7, kind: output, shape index: {}]  }
   0x1   :  { %370 = vmatprep.subr.bf16.mxu0 %v438_v0  ;;  %v420_v1 = vld [vmem:[%s573_s1] sm:$0xff]   ;;  %374 = vmatprep.mubr.msk.bf16.mxu0 %vm439_vm0, %v438_v0  ;;  %v421_v2 = vld [vmem:[%s573_s1 + $0x8] sm:$0xff]   ;;  %v424_v7 = vld [vmem:[%s575_s3 + $0x10] sm:$0xff]  }
   0x2   :  { %378 = vmatprep.subr.bf16.mxu1 %v438_v0  ;;  %394 = vmatprep.mubr.msk.bf16.mxu1 %vm439_vm0, %v438_v0  ;;  %v27_v3 = vld [vmem:[%s574_s0] sm:$0xff]  ;;  %v423_v6 = vld [vmem:[%s575_s3 + $0x8] sm:$0xff]   ;;  %v425_v8 = vld [vmem:[%s575_s3 + $0x18] sm:$0xff]  }
   0x3   :  { %371 = vmatpush3.bf16.msra.mxu0 %v420_v1  ;;  %v422_v4 = vld [vmem:[%s575_s3] sm:$0xff]   ;;  %v28_v5 = vpack.c.bf16 %v27_v3, %v27_v3  ;;  %v427_v10 = vld [vmem:[%s575_s3 + $0x28] sm:$0xff]   ;;  %v428_v11 = vld [vmem:[%s575_s3 + $0x30] sm:$0xff]  }
   0x4   :  { %372 = vmatprep.subr.bf16.mxu0 %v438_v0  ;;  %379 = vmatpush3.bf16.msra.mxu1 %v422_v4  ;;  %v426_v9 = vld [vmem:[%s575_s3 + $0x20] sm:$0xff]   ;;  %v429_v12 = vld [vmem:[%s575_s3 + $0x38] sm:$0xff]   ;;  %v431_v14 = vld [vmem:[%s576_s5 + $0x8] sm:$0xff]  }
   0x5   :  { %380 = vmatprep.subr.bf16.mxu1 %v438_v0  ;;  %v430_v13 = vld [vmem:[%s576_s5] sm:$0xff]   ;;  %v432_v15 = vld [vmem:[%s576_s5 + $0x10] sm:$0xff]   ;;  %v433_v16 = vld [vmem:[%s576_s5 + $0x18] sm:$0xff]  }
   0x6   :  { %v434_v17 = vld [vmem:[%s576_s5 + $0x20] sm:$0xff]   ;;  %v435_v18 = vld [vmem:[%s576_s5 + $0x28] sm:$0xff]   ;;  %v436_v27 = vld [vmem:[%s576_s5 + $0x30] sm:$0xff]  }
   0x7   :  { %373 = vmatpush3.bf16.msra.mxu0 %v421_v2  ;;  %v327_v19 = vld [vmem:[%s577_s2] ss:$0 sm:$0xff]  ;;  %v437_v28 = vld [vmem:[%s576_s5 + $0x38] sm:$0xff]  }
   0x8   :  { %398 = vmatprep.subr.bf16.mxu0 %v438_v0  ;;  %381 = vmatpush3.bf16.msra.mxu1 %v423_v6  ;;  %v331_v29 = vld [vmem:[%s578_s4] ss:$0 sm:$0xff] }
   0x9   :  { %382 = vmatprep.subr.bf16.mxu1 %v438_v0  ;;  %v340_v37 = vld [vmem:[%s579_s6] ss:$0 sm:$0xff] }
   0xa   :  { %375 = vmatmul.mubr.msk.bf16.vlgmr.msra.gmra.mrb[0].mxu0 %vm52_vm1, %v28_v5 }
   0xb   :  { %414 = vmatprep.mubr.msk.bf16.mxu0 %vm439_vm0, %v438_v0  ;;  %399 = vmatpush3.bf16.msra.mxu0 %v430_v13 }
   0xc   :  { %383 = vmatpush3.bf16.msra.mxu1 %v424_v7  ;;  %400 = vmatprep.subr.bf16.mxu0 %v438_v0 }
   0xd   :  { %384 = vmatprep.subr.bf16.mxu1 %v438_v0 }
   0xf   :  { %401 = vmatpush3.bf16.msra.mxu0 %v431_v14 }
  0x10   :  { %385 = vmatpush3.bf16.msra.mxu1 %v425_v8  ;;  %402 = vmatprep.subr.bf16.mxu0 %v438_v0 }
  0x11   :  { %386 = vmatprep.subr.bf16.mxu1 %v438_v0 }
  0x13   :  { %403 = vmatpush3.bf16.msra.mxu0 %v432_v15 }
  0x14   :  { %387 = vmatpush3.bf16.msra.mxu1 %v426_v9  ;;  %404 = vmatprep.subr.bf16.mxu0 %v438_v0 }
  0x15   :  { %388 = vmatprep.subr.bf16.mxu1 %v438_v0 }
  0x17   :  { %405 = vmatpush3.bf16.msra.mxu0 %v433_v16 }
  0x18   :  { %389 = vmatpush3.bf16.msra.mxu1 %v427_v10  ;;  %406 = vmatprep.subr.bf16.mxu0 %v438_v0 }
  0x19   :  { %390 = vmatprep.subr.bf16.mxu1 %v438_v0 }
  0x1b   :  { %407 = vmatpush3.bf16.msra.mxu0 %v434_v17 }
  0x1c   :  { %391 = vmatpush3.bf16.msra.mxu1 %v428_v11  ;;  %408 = vmatprep.subr.bf16.mxu0 %v438_v0 }
  0x1d   :  { %392 = vmatprep.subr.bf16.mxu1 %v438_v0 }
  0x1f   :  { %409 = vmatpush3.bf16.msra.mxu0 %v435_v18 }
  0x20   :  { %393 = vmatpush3.bf16.msra.mxu1 %v429_v12  ;;  %410 = vmatprep.subr.bf16.mxu0 %v438_v0 }
  0x23   :  { %411 = vmatpush3.bf16.msra.mxu0 %v436_v27 }
  0x24   :  { %412 = vmatprep.subr.bf16.mxu0 %v438_v0 }
  0x27   :  { %413 = vmatpush3.bf16.msra.mxu0 %v437_v28 }
  0xdd   :  { %v90_v20 = vpop.f32.mrb[0].mxu0 }
  0xde   :  { %v91_v21 = vadd.f32 %v327_v19, %v90_v20  ;;  %v376_v22 = vpop.f32.mrb[1].mxu0 }
  0xdf   :  { %v93_v23 = vpop.f32.mrb[2].mxu0 }
  0xe0   :  { %v96_v24 = vmax.f32 %v91_v21, 0.0  ;;  %v377_v25 = vpop.f32.mrb[3].mxu0 }
  0xe2   :  { %v97_v26 = vpack.c.bf16 %v96_v24, %v96_v24 }
  0xe4   :  { %395 = vmatmul.mubr.bf16.vlgmr.msra.gmra.mrb[0].mxu1 %v97_v26 }
 0x1b7   :  { %v203_v30 = vpop.f32.mrb[0].mxu1 }
 0x1b8   :  { %v204_v31 = vadd.f32 %v331_v29, %v203_v30  ;;  %v396_v32 = vpop.f32.mrb[1].mxu1 }
 0x1b9   :  { %v206_v33 = vpop.f32.mrb[2].mxu1 }
 0x1ba   :  { %v209_v34 = vmax.f32 %v204_v31, 0.0  ;;  %v397_v35 = vpop.f32.mrb[3].mxu1 }
 0x1bc   :  { %v210_v36 = vpack.c.bf16 %v209_v34, %v209_v34 }
 0x1be   :  { %415 = vmatmul.mubr.bf16.vlgmr.msra.gmra.mrb[4].mxu0 %v210_v36 }
 0x291   :  { %v316_v38 = vpop.f32.mrb[4].mxu0 }
 0x292   :  { %v317_v39 = vadd.f32 %v340_v37, %v316_v38  ;;  %v416_v40 = vpop.f32.mrb[5].mxu0 }
 0x293   :  { %v319_v41 = vpop.f32.mrb[6].mxu0 }
 0x294   :  { %322 = vst [vmem:[%s580_s7] sm:$0xff] %v317_v39  ;;  %v417_v42 = vpop.f32.mrb[7].mxu0 }

</bundles_post_ra>
